<compile_context>
chip_gen: v6e
topology: v6e:2x2x1
jax: 0.10.0
libtpu: 0.0.40
codegen_flags: <defaults>
</compile_context>

<pallas_src>
import functools

import jax
import jax.numpy as jnp
from jax.experimental import pallas as pl
from jax.experimental.pallas import tpu as pltpu


def _leaky_relu(x, slope=0.2):
    return jnp.where(x > 0, x, slope * x)


def _disc_kernel(x_ref,
                 w1_ref, b1_ref,
                 w2_ref, b2_ref,
                 w3_ref, b3_ref,
                 w4_ref, b4_ref,
                 o_ref):
    # All four layers fused in VMEM for one batch tile (batch rows on sublanes).
    x = x_ref[...].astype(jnp.float32)

    h = jnp.dot(x, w1_ref[...], preferred_element_type=jnp.float32) + b1_ref[...]
    h = _leaky_relu(h)

    h = jnp.dot(h, w2_ref[...], preferred_element_type=jnp.float32) + b2_ref[...]
    h = _leaky_relu(h)

    h = jnp.dot(h, w3_ref[...], preferred_element_type=jnp.float32) + b3_ref[...]
    h = _leaky_relu(h)

    # Final Linear(hidden, 1): elementwise multiply (VPU) + lane reduction
    # (XLU) instead of an N=1 MXU matmul that would use 1 of 128 columns.
    logits = jnp.sum(h * w4_ref[...], axis=-1, keepdims=True) + b4_ref[...]
    o_ref[...] = logits.astype(o_ref.dtype)


def _round_up(x, m):
    return ((x + m - 1) // m) * m


def _pick_batch_tile(B, im_dim, hidden_dim, requested=1024):
    """Generation-safe batch tile: big enough to amortize per-step overhead
    and feed the MXU with many rows, small enough to fit the scoped-VMEM
    defaults on v5e/v6e/v7x, and split so the grid has >= 2 steps for large
    batches (lets v7x shard across its 2 TensorCores)."""
    tile = min(int(requested), _round_up(B, 8))
    if B >= 256:
        tile = min(tile, _round_up((B + 1) // 2, 8))
    # Conservative per-row VMEM estimate (bytes):
    #   double-buffered x tile + fp32 cast of x + fp32 activation chain
    #   (4h + 2h + h) + lane-padded (tile, 1) output block (double-buffered).
    per_row_bytes = 4 * (2 * im_dim + im_dim + 7 * hidden_dim) + 1024
    budget_bytes = 12 * 1024 * 1024
    max_rows = max(8, budget_bytes // max(per_row_bytes, 1))
    tile = min(tile, (max_rows // 8) * 8)
    return max(8, (tile // 8) * 8)


def init_discriminator_params(key, im_dim, hidden_dim):
    """Deterministic init mimicking PyTorch Linear default U(-1/sqrt(fan_in), ...)."""
    dims = [im_dim, hidden_dim * 4, hidden_dim * 2, hidden_dim, 1]
    params = []
    for i in range(4):
        key, kw, kb = jax.random.split(key, 3)
        fan_in = dims[i]
        bound = 1.0 / jnp.sqrt(jnp.float32(fan_in))
        # Stored directly as (in_dim, out_dim); biases as (1, out_dim).
        w = jax.random.uniform(kw, (dims[i], dims[i + 1]), jnp.float32, -bound, bound)
        b = jax.random.uniform(kb, (1, dims[i + 1]), jnp.float32, -bound, bound)
        params.append((w, b))
    return params


@functools.partial(jax.jit, static_argnames=("batch_tile",))
def gans_discriminator(x, params, batch_tile=None):
    """x: (B, im_dim) float32 -> (B, 1) float32."""
    B, im_dim = x.shape
    (w1, b1), (w2, b2), (w3, b3), (w4, b4) = params
    hidden_dim = w3.shape[1]

    tile = _pick_batch_tile(B, im_dim, hidden_dim,
                            requested=batch_tile if batch_tile else 1024)
    B_pad = _round_up(B, tile)
    x_pad = x if B_pad == B else jnp.pad(x, ((0, B_pad - B), (0, 0)))

    # Final-layer weight as a (1, hidden) row for in-kernel broadcasting.
    w4_row = jnp.reshape(w4, (1, hidden_dim))

    grid = (B_pad // tile,)

    def const_spec(arr):
        # Whole (small) parameter array; constant block index => Pallas DMAs
        # it once and it stays resident in VMEM across all grid steps.
        return pl.BlockSpec(arr.shape, lambda i: (0, 0))

    out = pl.pallas_call(
        _disc_kernel,
        out_shape=jax.ShapeDtypeStruct((B_pad, 1), jnp.float32),
        grid=grid,
        in_specs=[
            pl.BlockSpec((tile, im_dim), lambda i: (i, 0)),
            const_spec(w1), const_spec(b1),
            const_spec(w2), const_spec(b2),
            const_spec(w3), const_spec(b3),
            const_spec(w4_row), const_spec(b4),
        ],
        out_specs=pl.BlockSpec((tile, 1), lambda i: (i, 0)),
        compiler_params=pltpu.CompilerParams(
            dimension_semantics=("parallel",),
        ),
    )(x_pad, w1, b1, w2, b2, w3, b3, w4_row, b4)

    return out[:B]


def _reference(x, params):
    h = x
    for i, (w, b) in enumerate(params):
        h = h @ w + b
        if i < 3:
            h = jnp.where(h > 0, h, 0.2 * h)
    return h


if __name__ == "__main__":
    key = jax.random.PRNGKey(0)
    k_x, k_p, k_x2 = jax.random.split(key, 3)

    im_dim, hidden_dim = 32, 8  # layer dims: 32 -> 32 -> 16 -> 8 -> 1
    params = init_discriminator_params(k_p, im_dim, hidden_dim)

    # Small, tile-aligned batch (single grid step).
    x = jax.random.normal(k_x, (64, im_dim), dtype=jnp.float32)
    out = jax.block_until_ready(gans_discriminator(x, params))
    ref = _reference(x, params)
    assert out.shape == (64, 1)
    assert jnp.allclose(out, ref, atol=1e-5, rtol=1e-5), "mismatch vs JAX reference"

    # Ragged batch (exercises wrapper padding + a multi-step parallel grid).
    x2 = jax.random.normal(k_x2, (300, im_dim), dtype=jnp.float32)
    out2 = jax.block_until_ready(gans_discriminator(x2, params))
    ref2 = _reference(x2, params)
    assert out2.shape == (300, 1)
    assert jnp.allclose(out2, ref2, atol=1e-5, rtol=1e-5), "mismatch vs JAX reference"

    print("KERNEL_OK")
</pallas_src>

<mosaic_0001>
module attributes {stable_mosaic.version = 11 : i64} {
  func.func @_disc_kernel(%arg0: i32, %arg1: memref<64x32xf32, #tpu.memory_space<vmem>>, %arg2: memref<32x32xf32, #tpu.memory_space<vmem>>, %arg3: memref<1x32xf32, #tpu.memory_space<vmem>>, %arg4: memref<32x16xf32, #tpu.memory_space<vmem>>, %arg5: memref<1x16xf32, #tpu.memory_space<vmem>>, %arg6: memref<16x8xf32, #tpu.memory_space<vmem>>, %arg7: memref<1x8xf32, #tpu.memory_space<vmem>>, %arg8: memref<1x8xf32, #tpu.memory_space<vmem>>, %arg9: memref<1x1xf32, #tpu.memory_space<vmem>>, %arg10: memref<64x1xf32, #tpu.memory_space<vmem>>) attributes {dimension_semantics = [#tpu.dimension_semantics<parallel>], iteration_bounds = array<i64: 1>, scalar_prefetch = 0 : i64, scratch_operands = 0 : i64, tpu.core_type = #tpu.core_type<tc>, window_params = [{transform_indices = @transform_0, window_bounds = array<i64: 64, 32>}, {pipeline_mode = #tpu.pipeline_mode<synchronous>, transform_indices = @transform_1, window_bounds = array<i64: 32, 32>}, {pipeline_mode = #tpu.pipeline_mode<synchronous>, transform_indices = @transform_2, window_bounds = array<i64: 1, 32>}, {pipeline_mode = #tpu.pipeline_mode<synchronous>, transform_indices = @transform_3, window_bounds = array<i64: 32, 16>}, {pipeline_mode = #tpu.pipeline_mode<synchronous>, transform_indices = @transform_4, window_bounds = array<i64: 1, 16>}, {pipeline_mode = #tpu.pipeline_mode<synchronous>, transform_indices = @transform_5, window_bounds = array<i64: 16, 8>}, {pipeline_mode = #tpu.pipeline_mode<synchronous>, transform_indices = @transform_6, window_bounds = array<i64: 1, 8>}, {pipeline_mode = #tpu.pipeline_mode<synchronous>, transform_indices = @transform_7, window_bounds = array<i64: 1, 8>}, {pipeline_mode = #tpu.pipeline_mode<synchronous>, transform_indices = @transform_8, window_bounds = array<i64: 1, 1>}, {transform_indices = @transform_9, window_bounds = array<i64: 64, 1>}]} {
    %c0 = arith.constant 0 : index
    %c0_0 = arith.constant 0 : index
    %0 = vector.load %arg1[%c0, %c0_0] : memref<64x32xf32, #tpu.memory_space<vmem>>, vector<64x32xf32>
    %c0_1 = arith.constant 0 : index
    %c0_2 = arith.constant 0 : index
    %1 = vector.load %arg2[%c0_1, %c0_2] : memref<32x32xf32, #tpu.memory_space<vmem>>, vector<32x32xf32>
    %cst = arith.constant dense<0.000000e+00> : vector<64x32xf32>
    %2 = tpu.matmul %0, %1, %cst {dimension_numbers = #tpu.dot_dimension_numbers<[1], [0], [0], [1], [0, 0, 1, 1], [], []>} : vector<64x32xf32>, vector<32x32xf32>, vector<64x32xf32> -> vector<64x32xf32>
    %c0_3 = arith.constant 0 : index
    %c0_4 = arith.constant 0 : index
    %3 = vector.load %arg3[%c0_3, %c0_4] : memref<1x32xf32, #tpu.memory_space<vmem>>, vector<1x32xf32>
    %4 = vector.broadcast %3 : vector<1x32xf32> to vector<64x32xf32>
    %5 = arith.addf %2, %4 : vector<64x32xf32>
    %cst_5 = arith.constant 0.000000e+00 : f32
    %6 = vector.broadcast %cst_5 : f32 to vector<64x32xf32>
    %7 = arith.cmpf ogt, %5, %6 : vector<64x32xf32>
    %cst_6 = arith.constant 2.000000e-01 : f32
    %8 = vector.broadcast %cst_6 : f32 to vector<64x32xf32>
    %9 = arith.mulf %8, %5 : vector<64x32xf32>
    %10 = arith.select %7, %5, %9 : vector<64x32xi1>, vector<64x32xf32>
    %c0_7 = arith.constant 0 : index
    %c0_8 = arith.constant 0 : index
    %11 = vector.load %arg4[%c0_7, %c0_8] : memref<32x16xf32, #tpu.memory_space<vmem>>, vector<32x16xf32>
    %cst_9 = arith.constant dense<0.000000e+00> : vector<64x16xf32>
    %12 = tpu.matmul %10, %11, %cst_9 {dimension_numbers = #tpu.dot_dimension_numbers<[1], [0], [0], [1], [0, 0, 1, 1], [], []>} : vector<64x32xf32>, vector<32x16xf32>, vector<64x16xf32> -> vector<64x16xf32>
    %c0_10 = arith.constant 0 : index
    %c0_11 = arith.constant 0 : index
    %13 = vector.load %arg5[%c0_10, %c0_11] : memref<1x16xf32, #tpu.memory_space<vmem>>, vector<1x16xf32>
    %14 = vector.broadcast %13 : vector<1x16xf32> to vector<64x16xf32>
    %15 = arith.addf %12, %14 : vector<64x16xf32>
    %cst_12 = arith.constant 0.000000e+00 : f32
    %16 = vector.broadcast %cst_12 : f32 to vector<64x16xf32>
    %17 = arith.cmpf ogt, %15, %16 : vector<64x16xf32>
    %cst_13 = arith.constant 2.000000e-01 : f32
    %18 = vector.broadcast %cst_13 : f32 to vector<64x16xf32>
    %19 = arith.mulf %18, %15 : vector<64x16xf32>
    %20 = arith.select %17, %15, %19 : vector<64x16xi1>, vector<64x16xf32>
    %c0_14 = arith.constant 0 : index
    %c0_15 = arith.constant 0 : index
    %21 = vector.load %arg6[%c0_14, %c0_15] : memref<16x8xf32, #tpu.memory_space<vmem>>, vector<16x8xf32>
    %cst_16 = arith.constant dense<0.000000e+00> : vector<64x8xf32>
    %22 = tpu.matmul %20, %21, %cst_16 {dimension_numbers = #tpu.dot_dimension_numbers<[1], [0], [0], [1], [0, 0, 1, 1], [], []>} : vector<64x16xf32>, vector<16x8xf32>, vector<64x8xf32> -> vector<64x8xf32>
    %c0_17 = arith.constant 0 : index
    %c0_18 = arith.constant 0 : index
    %23 = vector.load %arg7[%c0_17, %c0_18] : memref<1x8xf32, #tpu.memory_space<vmem>>, vector<1x8xf32>
    %24 = vector.broadcast %23 : vector<1x8xf32> to vector<64x8xf32>
    %25 = arith.addf %22, %24 : vector<64x8xf32>
    %cst_19 = arith.constant 0.000000e+00 : f32
    %26 = vector.broadcast %cst_19 : f32 to vector<64x8xf32>
    %27 = arith.cmpf ogt, %25, %26 : vector<64x8xf32>
    %cst_20 = arith.constant 2.000000e-01 : f32
    %28 = vector.broadcast %cst_20 : f32 to vector<64x8xf32>
    %29 = arith.mulf %28, %25 : vector<64x8xf32>
    %30 = arith.select %27, %25, %29 : vector<64x8xi1>, vector<64x8xf32>
    %c0_21 = arith.constant 0 : index
    %c0_22 = arith.constant 0 : index
    %31 = vector.load %arg8[%c0_21, %c0_22] : memref<1x8xf32, #tpu.memory_space<vmem>>, vector<1x8xf32>
    %32 = vector.broadcast %31 : vector<1x8xf32> to vector<64x8xf32>
    %33 = arith.mulf %30, %32 : vector<64x8xf32>
    %cst_23 = arith.constant dense<0.000000e+00> : vector<64xf32>
    %34 = vector.multi_reduction <add>, %33, %cst_23 [1] : vector<64x8xf32> to vector<64xf32>
    %35 = vector.shape_cast %34 : vector<64xf32> to vector<64x1xf32>
    %c0_24 = arith.constant 0 : index
    %c0_25 = arith.constant 0 : index
    %36 = vector.load %arg9[%c0_24, %c0_25] : memref<1x1xf32, #tpu.memory_space<vmem>>, vector<1x1xf32>
    %37 = vector.broadcast %36 : vector<1x1xf32> to vector<64x1xf32>
    %38 = arith.addf %35, %37 : vector<64x1xf32>
    %c0_26 = arith.constant 0 : index
    %c0_27 = arith.constant 0 : index
    %39 = vector.load %arg10[%c0_26, %c0_27] : memref<64x1xf32, #tpu.memory_space<vmem>>, vector<64x1xf32>
    tpu.vector_store %arg10[%c0_26, %c0_27], %38 {strides = array<i32>} : memref<64x1xf32, #tpu.memory_space<vmem>>, vector<64x1xf32>,
    return
  }
  func.func @transform_0(%arg0: i32) -> (i32, i32) {
    %c0_i32 = arith.constant 0 : i32
    %c0_i32_0 = arith.constant 0 : i32
    return %arg0, %c0_i32 : i32, i32
  }
  func.func @transform_1(%arg0: i32) -> (i32, i32) {
    %c0_i32 = arith.constant 0 : i32
    %c0_i32_0 = arith.constant 0 : i32
    %c0_i32_1 = arith.constant 0 : i32
    return %c0_i32, %c0_i32_0 : i32, i32
  }
  func.func @transform_2(%arg0: i32) -> (i32, i32) {
    %c0_i32 = arith.constant 0 : i32
    %c0_i32_0 = arith.constant 0 : i32
    %c0_i32_1 = arith.constant 0 : i32
    return %c0_i32, %c0_i32_0 : i32, i32
  }
  func.func @transform_3(%arg0: i32) -> (i32, i32) {
    %c0_i32 = arith.constant 0 : i32
    %c0_i32_0 = arith.constant 0 : i32
    %c0_i32_1 = arith.constant 0 : i32
    return %c0_i32, %c0_i32_0 : i32, i32
  }
  func.func @transform_4(%arg0: i32) -> (i32, i32) {
    %c0_i32 = arith.constant 0 : i32
    %c0_i32_0 = arith.constant 0 : i32
    %c0_i32_1 = arith.constant 0 : i32
    return %c0_i32, %c0_i32_0 : i32, i32
  }
  func.func @transform_5(%arg0: i32) -> (i32, i32) {
    %c0_i32 = arith.constant 0 : i32
    %c0_i32_0 = arith.constant 0 : i32
    %c0_i32_1 = arith.constant 0 : i32
    return %c0_i32, %c0_i32_0 : i32, i32
  }
  func.func @transform_6(%arg0: i32) -> (i32, i32) {
    %c0_i32 = arith.constant 0 : i32
    %c0_i32_0 = arith.constant 0 : i32
    %c0_i32_1 = arith.constant 0 : i32
    return %c0_i32, %c0_i32_0 : i32, i32
  }
  func.func @transform_7(%arg0: i32) -> (i32, i32) {
    %c0_i32 = arith.constant 0 : i32
    %c0_i32_0 = arith.constant 0 : i32
    %c0_i32_1 = arith.constant 0 : i32
    return %c0_i32, %c0_i32_0 : i32, i32
  }
  func.func @transform_8(%arg0: i32) -> (i32, i32) {
    %c0_i32 = arith.constant 0 : i32
    %c0_i32_0 = arith.constant 0 : i32
    %c0_i32_1 = arith.constant 0 : i32
    return %c0_i32, %c0_i32_0 : i32, i32
  }
  func.func @transform_9(%arg0: i32) -> (i32, i32) {
    %c0_i32 = arith.constant 0 : i32
    %c0_i32_0 = arith.constant 0 : i32
    return %arg0, %c0_i32 : i32, i32
  }
}

</mosaic_0001>

<bundles_post_ra>
// kernel: gans_discriminator.1
= control target key start
LH: loop header
LB: loop body
LE: loop exit
PB: predicated region body
PF: predicated region fallthrough
CT: control target
= control target key end

     0   :  { %vm53_vm0 = vcmask 261120   ;;  %vm380_vm9 = vcmask 130048   ;;  %s912_s1 = inlined_call_operand.vmem [shape: f32[32,32], index: 1, kind: input, shape index: {}]   ;;  %s913_s0 = inlined_call_operand.vmem [shape: f32[64,32], index: 0, kind: input, shape index: {}]   ;;  %s914_s3 = inlined_call_operand.vmem [shape: f32[32,16], index: 3, kind: input, shape index: {}]   ;;  %s915_s2 = inlined_call_operand.vmem [shape: f32[1,32], index: 2, kind: input, shape index: {}]   ;;  %s916_s5 = inlined_call_operand.vmem [shape: f32[16,8], index: 5, kind: input, shape index: {}]   ;;  %s917_s4 = inlined_call_operand.vmem [shape: f32[1,16], index: 4, kind: input, shape index: {}]   ;;  %s918_s8 = inlined_call_operand.<no memory space> [shape: f32[1,1], index: 8, kind: input, shape index: {}]   ;;  %s919_s6 = inlined_call_operand.vmem [shape: f32[1,8], index: 6, kind: input, shape index: {}]   ;;  %s920_s7 = inlined_call_operand.vmem [shape: f32[1,8], index: 7, kind: input, shape index: {}]   ;;  %s921_s9 = inlined_call_operand.vmem [shape: f32[64,1], index: 9, kind: output, shape index: {}]  }
   0x1   :  { %v45_v0 = vld [vmem:[%s912_s1 + $0x18] sm:$0xff]  ;;  %v44_v1 = vld [vmem:[%s912_s1 + $0x10] sm:$0xff]  ;;  %v34_v2 = vld [vmem:[%s913_s0] sm:$0xff] }
   0x2   :  { %665 = vmatprep.subr.mxu0 %v45_v0  ;;  %721 = vmatprep.subr.mxu1 %v45_v0  ;;  %v43_v3 = vld [vmem:[%s912_s1 + $0x8] sm:$0xff]  ;;  %v42_v4 = vld [vmem:[%s912_s1] sm:$0xff]  ;;  %v36_v6 = vld [vmem:[%s913_s0 + $0x10] sm:$0xff] }
   0x3   :  { %666 = vmatpush3.msra.mxu0 %v45_v0  ;;  %725 = vmatpush3.msra.mxu1 %v45_v0  ;;  %v35_v5 = vld [vmem:[%s913_s0 + $0x8] sm:$0xff]  ;;  %v38_v7 = vld [vmem:[%s913_s0 + $0x20] sm:$0xff]  ;;  %v40_v9 = vld [vmem:[%s913_s0 + $0x30] sm:$0xff] }
   0x4   :  { %667 = vmatprep.subr.mxu0 %v44_v1  ;;  %673 = vmatprep.mubr.msk.f32.mxu0 %vm53_vm0, %v34_v2  ;;  %v39_v8 = vld [vmem:[%s913_s0 + $0x28] sm:$0xff]  ;;  %v37_v10 = vld [vmem:[%s913_s0 + $0x18] sm:$0xff]  ;;  %v209_v13 = vld [vmem:[%s914_s3 + $0x10] sm:$0xff] }
   0x5   :  { %668 = vmatpush3.msra.mxu0 %v44_v1  ;;  %722 = vmatprep.subr.mxu1 %v44_v1  ;;  %v41_v11 = vld [vmem:[%s913_s0 + $0x38] sm:$0xff]  ;;  %v208_v14 = vld [vmem:[%s914_s3 + $0x8] sm:$0xff]  ;;  %v207_v15 = vld [vmem:[%s914_s3] sm:$0xff] }
   0x6   :  { %669 = vmatprep.subr.mxu0 %v43_v3  ;;  %726 = vmatpush3.msra.mxu1 %v44_v1  ;;  %v210_v12 = vld [vmem:[%s914_s3 + $0x18] sm:$0xff]  ;;  %v602_v16 = vld [vmem:[%s915_s2] ss:$0 sm:$0xff]  ;;  %v372_v49 = vld [vmem:[%s916_s5 + $0x8] sm:$0xff] }
   0x7   :  { %670 = vmatpush3.msra.mxu0 %v43_v3  ;;  %723 = vmatprep.subr.mxu1 %v43_v3  ;;  %v371_v50 = vld [vmem:[%s916_s5] sm:$0xff] }
   0x8   :  { %671 = vmatprep.subr.mxu0 %v42_v4  ;;  %727 = vmatpush3.msra.mxu1 %v43_v3  ;;  %v611_v51 = vld [vmem:[%s917_s4] ss:$0 sm:$0xff] }
   0x9   :  { %672 = vmatpush3.msra.mxu0 %v42_v4  ;;  %724 = vmatprep.subr.mxu1 %v42_v4 }
   0xa   :  { %674 = vmatmul.mubr.msk.f32.vlgmr.msra.gmra.mxu0 %vm53_vm0, %v35_v5  ;;  %728 = vmatpush3.msra.mxu1 %v42_v4 }
   0xb   :  { %676 = vmatprep.mubr.msk.f32.mxu0 %vm53_vm0, %v36_v6  ;;  %679 = vmatprep.mubr.msk.f32.mxu1 %vm53_vm0, %v38_v7 }
   0xc   :  { %680 = vmatmul.mubr.msk.f32.vlgmr.msra.gmra.mxu1 %vm53_vm0, %v39_v8  ;;  %685 = vmatprep.subr.mxu1 %v210_v12 }
   0xd   :  { %682 = vmatprep.mubr.msk.f32.mxu1 %vm53_vm0, %v40_v9  ;;  %686 = vmatpush3.msra.mxu1 %v210_v12 }
   0xe   :  { %677 = vmatmul.mubr.msk.f32.gmra.mxu0 %vm53_vm0, %v37_v10  ;;  %687 = vmatprep.subr.mxu1 %v209_v13 }
   0xf   :  { %688 = vmatpush3.msra.mxu1 %v209_v13  ;;  %705 = vmatprep.subr.mxu0 %v372_v49 }
  0x10   :  { %683 = vmatmul.mubr.msk.f32.gmra.mxu1 %vm53_vm0, %v41_v11  ;;  %689 = vmatprep.subr.mxu1 %v208_v14 }
  0x11   :  { %690 = vmatpush3.msra.mxu1 %v208_v14  ;;  %706 = vmatpush3.msra.mxu0 %v372_v49 }
  0x12   :  { %691 = vmatprep.subr.mxu1 %v207_v15  ;;  %707 = vmatprep.subr.mxu0 %v371_v50 }
  0x13   :  { %692 = vmatpush3.msra.mxu1 %v207_v15  ;;  %708 = vmatpush3.msra.mxu0 %v371_v50 }
  0xca   :  { %v675_v17 = vpop.f32.mrf.mxu0 }
  0xcb   :  { %v150_v18 = vadd.f32 %v675_v17, %v602_v16 }
  0xcc   :  { %v144_v19 = vpop.f32.mrf.mxu0  ;;  %v681_v20 = vpop.f32.mrf.mxu1 }
  0xcd   :  { %v145_v21 = vadd.f32 %v602_v16, %v144_v19  ;;  %v192_v22 = vmul.f32 0.2, %v150_v18  ;;  %vm184_vm1 = vcmp.gt.f32.partialorder %v150_v18, 0.0  ;;  %v170_v31 = vadd.f32 %v681_v20, %v602_v16 }
  0xce   :  { %v678_v23 = vpop.f32.mrf.mxu0  ;;  %v164_v24 = vpop.f32.mrf.mxu1  ;;  %v14_v20 = vstv %s918_s8 }
  0xcf   :  { %vm183_vm2 = vcmp.gt.f32.partialorder %v145_v21, 0.0  ;;  %v191_v25 = vmul.f32 0.2, %v145_v21  ;;  %v160_v26 = vadd.f32 %v678_v23, %v602_v16  ;;  %v165_v28 = vadd.f32 %v602_v16, %v164_v24  ;;  %15 = vst [vmem:[#allocation2] sm:$0x1] %v14_v20 }
  0xd0   :  { %v154_v27 = vpop.f32.mrf.mxu0  ;;  %v684_v29 = vpop.f32.mrf.mxu1  ;;  %v200_v33 = vsel %vm184_vm1, %v150_v18, %v192_v22  ;;  %v196_v42 = vmul.f32 0.2, %v170_v31  ;;  %vm188_vm7 = vcmp.gt.f32.partialorder %v170_v31, 0.0 }
  0xd1   :  { %v155_v30 = vadd.f32 %v602_v16, %v154_v27  ;;  %v199_v32 = vsel %vm183_vm2, %v145_v21, %v191_v25  ;;  %v194_v34 = vmul.f32 0.2, %v160_v26  ;;  %vm187_vm3 = vcmp.gt.f32.partialorder %v165_v28, 0.0  ;;  %v620_v21 = vld [vmem:[%s919_s6] ss:$0 sm:$0xff] }
  0xd2   :  { %v195_v35 = vmul.f32 0.2, %v165_v28  ;;  %693 = vmatprep.mubr.msk.f32.mxu1 %vm53_vm0, %v199_v32  ;;  %v174_v36 = vpop.f32.mrf.mxu1  ;;  %vm186_vm4 = vcmp.gt.f32.partialorder %v160_v26, 0.0  ;;  %v180_v43 = vadd.f32 %v684_v29, %v602_v16  ;;  %v204_v47 = vsel %vm188_vm7, %v170_v31, %v196_v42  ;;  %v629_v27 = vld [vmem:[%s920_s7] ss:$0 sm:$0xff] }
  0xd3   :  { %vm185_vm5 = vcmp.gt.f32.partialorder %v155_v30, 0.0  ;;  %v193_v37 = vmul.f32 0.2, %v155_v30  ;;  %694 = vmatmul.mubr.msk.f32.vlgmr.msra.gmra.mxu1 %vm53_vm0, %v200_v33  ;;  %v175_v38 = vadd.f32 %v602_v16, %v174_v36  ;;  %v202_v44 = vsel %vm186_vm4, %v160_v26, %v194_v34 }
  0xd4   :  { %v203_v41 = vsel %vm187_vm3, %v165_v28, %v195_v35  ;;  %v198_v46 = vmul.f32 0.2, %v180_v43  ;;  %vm190_vm8 = vcmp.gt.f32.partialorder %v180_v43, 0.0  ;;  %vm549_vm3 = vcmask 64512  }
  0xd5   :  { %v197_v39 = vmul.f32 0.2, %v175_v38  ;;  %v201_v40 = vsel %vm185_vm5, %v155_v30, %v193_v37  ;;  %vm189_vm6 = vcmp.gt.f32.partialorder %v175_v38, 0.0 }
  0xd6   :  { %696 = vmatprep.mubr.msk.f32.mxu1 %vm53_vm0, %v201_v40  ;;  %v206_v48 = vsel %vm190_vm8, %v180_v43, %v198_v46 }
  0xd7   :  { %697 = vmatmul.mubr.msk.f32.gmra.mxu1 %vm53_vm0, %v202_v44  ;;  %v205_v45 = vsel %vm189_vm6, %v175_v38, %v197_v39 }
  0xd8   :  { %699 = vmatprep.mubr.msk.f32.mxu1 %vm53_vm0, %v203_v41 }
  0xdb   :  { %700 = vmatmul.mubr.msk.f32.gmra.mxu1 %vm53_vm0, %v204_v47 }
  0xdc   :  { %702 = vmatprep.mubr.msk.f32.mxu1 %vm53_vm0, %v205_v45 }
  0xdf   :  { %703 = vmatmul.mubr.msk.f32.gmra.mxu1 %vm53_vm0, %v206_v48 }
 0x193   :  { %v695_v52 = vpop.f32.mrf.mxu1 }
 0x194   :  { %v314_v53 = vadd.f32 %v695_v52, %v611_v51 }
 0x195   :  { %v308_v54 = vpop.f32.mrf.mxu1 }
 0x196   :  { %v309_v55 = vadd.f32 %v611_v51, %v308_v54  ;;  %v356_v56 = vmul.f32 0.2, %v314_v53  ;;  %vm348_vm10 = vcmp.gt.f32.partialorder %v314_v53, 0.0 }
 0x197   :  { %v698_v57 = vpop.f32.mrf.mxu1 }
 0x198   :  { %vm347_vm11 = vcmp.gt.f32.partialorder %v309_v55, 0.0  ;;  %v355_v58 = vmul.f32 0.2, %v309_v55  ;;  %v324_v59 = vadd.f32 %v698_v57, %v611_v51  ;;  %v364_v63 = vsel %vm348_vm10, %v314_v53, %v356_v56 }
 0x199   :  { %v318_v60 = vpop.f32.mrf.mxu1 }
 0x19a   :  { %v319_v61 = vadd.f32 %v611_v51, %v318_v60  ;;  %v363_v62 = vsel %vm347_vm11, %v309_v55, %v355_v58  ;;  %v358_v0 = vmul.f32 0.2, %v324_v59  ;;  %vm350_vm12 = vcmp.gt.f32.partialorder %v324_v59, 0.0 }
 0x19b   :  { %v701_v1 = vpop.f32.mrf.mxu1  ;;  %709 = vmatprep.mubr.msk.f32.mxu0 %vm380_vm9, %v363_v62  ;;  %vm589_vm11 = vcmask 7168  }
 0x19c   :  { %vm349_vm13 = vcmp.gt.f32.partialorder %v319_v61, 0.0  ;;  %v357_v2 = vmul.f32 0.2, %v319_v61  ;;  %v334_v3 = vadd.f32 %v701_v1, %v611_v51  ;;  %710 = vmatmul.mubr.msk.f32.vlgmr.msra.gmra.mxu0 %vm380_vm9, %v364_v63  ;;  %v366_v9 = vsel %vm350_vm12, %v324_v59, %v358_v0 }
 0x19d   :  { %v328_v4 = vpop.f32.mrf.mxu1 }
 0x19e   :  { %v329_v5 = vadd.f32 %v611_v51, %v328_v4  ;;  %v365_v6 = vsel %vm349_vm13, %v319_v61, %v357_v2  ;;  %v360_v7 = vmul.f32 0.2, %v334_v3  ;;  %vm352_vm14 = vcmp.gt.f32.partialorder %v334_v3, 0.0 }
 0x19f   :  { %v704_v8 = vpop.f32.mrf.mxu1  ;;  %712 = vmatprep.mubr.msk.f32.mxu0 %vm380_vm9, %v365_v6 }
 0x1a0   :  { %vm351_vm15 = vcmp.gt.f32.partialorder %v329_v5, 0.0  ;;  %v359_v10 = vmul.f32 0.2, %v329_v5  ;;  %v344_v11 = vadd.f32 %v704_v8, %v611_v51  ;;  %713 = vmatmul.mubr.msk.f32.gmra.mxu0 %vm380_vm9, %v366_v9  ;;  %v368_v16 = vsel %vm352_vm14, %v334_v3, %v360_v7  ;;  %v630_v7 = vld [vmem:[#allocation2] ss:$0 sm:$0xff] }
 0x1a1   :  { %v338_v12 = vpop.f32.mrf.mxu1 }
 0x1a2   :  { %v339_v13 = vadd.f32 %v611_v51, %v338_v12  ;;  %v367_v14 = vsel %vm351_vm15, %v329_v5, %v359_v10  ;;  %v362_v15 = vmul.f32 0.2, %v344_v11  ;;  %vm354_vm0 = vcmp.gt.f32.partialorder %v344_v11, 0.0 }
 0x1a3   :  { %715 = vmatprep.mubr.msk.f32.mxu0 %vm380_vm9, %v367_v14 }
 0x1a4   :  { %vm353_vm1 = vcmp.gt.f32.partialorder %v339_v13, 0.0  ;;  %v361_v17 = vmul.f32 0.2, %v339_v13  ;;  %716 = vmatmul.mubr.msk.f32.gmra.mxu0 %vm380_vm9, %v368_v16  ;;  %v370_v19 = vsel %vm354_vm0, %v344_v11, %v362_v15 }
 0x1a6   :  { %v369_v18 = vsel %vm353_vm1, %v339_v13, %v361_v17 }
 0x1a7   :  { %718 = vmatprep.mubr.msk.f32.mxu0 %vm380_vm9, %v369_v18 }
 0x1a8   :  { %719 = vmatmul.mubr.msk.f32.gmra.mxu0 %vm380_vm9, %v370_v19 }
 0x25c   :  { %v711_v22 = vpop.f32.mrf.mxu0 }
 0x25d   :  { %v477_v23 = vadd.f32 %v711_v22, %v620_v21 }
 0x25e   :  { %v471_v24 = vpop.f32.mrf.mxu0 }
 0x25f   :  { %v519_v25 = vmul.f32 0.2, %v477_v23  ;;  %v472_v26 = vadd.f32 %v620_v21, %v471_v24  ;;  %vm511_vm2 = vcmp.gt.f32.partialorder %v477_v23, 0.0 }
 0x260   :  { %v714_v28 = vpop.f32.mrf.mxu0 }
 0x261   :  { %vm510_vm4 = vcmp.gt.f32.partialorder %v472_v26, 0.0  ;;  %v518_v29 = vmul.f32 0.2, %v472_v26  ;;  %v487_v30 = vadd.f32 %v714_v28, %v620_v21  ;;  %v527_v31 = vsel %vm511_vm2, %v477_v23, %v519_v25 }
 0x262   :  { %v481_v32 = vpop.f32.mrf.mxu0  ;;  %v542_v33 = vmul.f32 %v629_v27, %v527_v31 }
 0x263   :  { %v521_v34 = vmul.f32 0.2, %v487_v30  ;;  %v482_v35 = vadd.f32 %v620_v21, %v481_v32  ;;  %vm513_vm5 = vcmp.gt.f32.partialorder %v487_v30, 0.0  ;;  %v526_v36 = vsel %vm510_vm4, %v472_v26, %v518_v29 }
 0x264   :  { %v717_v37 = vpop.f32.mrf.mxu0  ;;  %v553_v38 = vsel %vm549_vm3, %v542_v33, 0.0  ;;  %v541_v39 = vmul.f32 %v629_v27, %v526_v36 }
 0x265   :  { %vm512_vm6 = vcmp.gt.f32.partialorder %v482_v35, 0.0  ;;  %v520_v40 = vmul.f32 0.2, %v482_v35  ;;  %v497_v41 = vadd.f32 %v717_v37, %v620_v21  ;;  %554 = vadd.xlane.f32.xlu0 %v553_v38  ;;  %v529_v42 = vsel %vm513_vm5, %v487_v30, %v521_v34 }
 0x266   :  { %v491_v43 = vpop.f32.mrf.mxu0  ;;  %v544_v44 = vmul.f32 %v629_v27, %v529_v42  ;;  %v550_v50 = vsel %vm549_vm3, %v541_v39, 0.0 }
 0x267   :  { %vm515_vm7 = vcmp.gt.f32.partialorder %v497_v41, 0.0  ;;  %v523_v45 = vmul.f32 0.2, %v497_v41  ;;  %v492_v46 = vadd.f32 %v620_v21, %v491_v43  ;;  %v528_v47 = vsel %vm512_vm6, %v482_v35, %v520_v40 }
 0x268   :  { %v720_v48 = vpop.f32.mrf.mxu0  ;;  %v559_v49 = vsel %vm549_vm3, %v544_v44, 0.0  ;;  %v543_v51 = vmul.f32 %v629_v27, %v528_v47 }
 0x269   :  { %vm514_vm8 = vcmp.gt.f32.partialorder %v492_v46, 0.0  ;;  %v522_v52 = vmul.f32 0.2, %v492_v46  ;;  %v507_v53 = vadd.f32 %v720_v48, %v620_v21  ;;  %560 = vadd.xlane.f32.xlu1 %v559_v49  ;;  %551 = vadd.xlane.f32.xlu0 %v550_v50  ;;  %v531_v54 = vsel %vm515_vm7, %v497_v41, %v523_v45 }
 0x26a   :  { %v501_v55 = vpop.f32.mrf.mxu0  ;;  %v556_v59 = vsel %vm549_vm3, %v543_v51, 0.0  ;;  %v546_v61 = vmul.f32 %v629_v27, %v531_v54 }
 0x26b   :  { %vm517_vm9 = vcmp.gt.f32.partialorder %v507_v53, 0.0  ;;  %v525_v56 = vmul.f32 0.2, %v507_v53  ;;  %v502_v57 = vadd.f32 %v620_v21, %v501_v55  ;;  %v530_v58 = vsel %vm514_vm8, %v492_v46, %v522_v52 }
 0x26c   :  { %v545_v60 = vmul.f32 %v629_v27, %v530_v58  ;;  %v565_v2 = vsel %vm549_vm3, %v546_v61, 0.0 }
 0x26d   :  { %vm516_vm10 = vcmp.gt.f32.partialorder %v502_v57, 0.0  ;;  %v524_v62 = vmul.f32 0.2, %v502_v57  ;;  %557 = vadd.xlane.f32.xlu1 %v556_v59  ;;  %v533_v63 = vsel %vm517_vm9, %v507_v53, %v525_v56 }
 0x26e   :  { %v562_v0 = vsel %vm549_vm3, %v545_v60, 0.0  ;;  %v548_v4 = vmul.f32 %v629_v27, %v533_v63 }
 0x26f   :  { %563 = vadd.xlane.f32.xlu0 %v562_v0  ;;  %v532_v1 = vsel %vm516_vm10, %v502_v57, %v524_v62 }
 0x270   :  { %v547_v3 = vmul.f32 %v629_v27, %v532_v1  ;;  %v571_v6 = vsel %vm549_vm3, %v548_v4, 0.0 }
 0x271   :  { %566 = vadd.xlane.f32.xlu1 %v565_v2 }
 0x272   :  { %v568_v5 = vsel %vm549_vm3, %v547_v3, 0.0 }
 0x273   :  { %569 = vadd.xlane.f32.xlu0 %v568_v5 }
 0x275   :  { %572 = vadd.xlane.f32.xlu1 %v571_v6 }
 0x2ee   :  { %v555_v8 = vpop.xlane.xlu0 %554 }
 0x2ef   :  { %v582_v9 = vadd.f32 %v630_v7, %v555_v8 }
 0x2f1   :  { %591 = vst.msk [vmem:[%s921_s9 + $0x8] sm:$0xff] %vm589_vm11, %v582_v9 }
 0x2f2   :  { %v561_v10 = vpop.xlane.xlu1 %560  ;;  %v552_v11 = vpop.xlane.xlu0 %551 }
 0x2f3   :  { %v584_v12 = vadd.f32 %v630_v7, %v561_v10  ;;  %v581_v13 = vadd.f32 %v630_v7, %v552_v11 }
 0x2f5   :  { %593 = vst.msk [vmem:[%s921_s9 + $0x18] sm:$0xff] %vm589_vm11, %v584_v12  ;;  %590 = vst.msk [vmem:[%s921_s9] sm:$0xff] %vm589_vm11, %v581_v13 }
 0x2f6   :  { %v558_v14 = vpop.xlane.xlu1 %557 }
 0x2f7   :  { %v583_v15 = vadd.f32 %v630_v7, %v558_v14 }
 0x2f8   :  { %v564_v16 = vpop.xlane.xlu0 %563 }
 0x2f9   :  { %592 = vst.msk [vmem:[%s921_s9 + $0x10] sm:$0xff] %vm589_vm11, %v583_v15  ;;  %v585_v17 = vadd.f32 %v630_v7, %v564_v16 }
 0x2fa   :  { %v567_v18 = vpop.xlane.xlu1 %566 }
 0x2fb   :  { %594 = vst.msk [vmem:[%s921_s9 + $0x20] sm:$0xff] %vm589_vm11, %v585_v17  ;;  %v586_v19 = vadd.f32 %v630_v7, %v567_v18 }
 0x2fc   :  { %v570_v20 = vpop.xlane.xlu0 %569 }
 0x2fd   :  { %595 = vst.msk [vmem:[%s921_s9 + $0x28] sm:$0xff] %vm589_vm11, %v586_v19  ;;  %v587_v21 = vadd.f32 %v630_v7, %v570_v20 }
 0x2fe   :  { %v573_v22 = vpop.xlane.xlu1 %572 }
 0x2ff   :  { %596 = vst.msk [vmem:[%s921_s9 + $0x30] sm:$0xff] %vm589_vm11, %v587_v21  ;;  %v588_v23 = vadd.f32 %v630_v7, %v573_v22 }
 0x301   :  { %597 = vst.msk [vmem:[%s921_s9 + $0x38] sm:$0xff] %vm589_vm11, %v588_v23 }

</bundles_post_ra>
